<compile_context>
chip_gen: v5e
topology: v5e:2x2
jax: 0.10.0
libtpu: 0.0.40
codegen_flags: <defaults>
</compile_context>

<pallas_src>
import functools

import jax
import jax.numpy as jnp
from jax import lax
from jax.experimental import pallas as pl
from jax.experimental.pallas import tpu as pltpu


def _round_up(x, m):
    return ((x + m - 1) // m) * m


def _cluster_rep_loss_kernel(x_ref, w_ref, b_ref, c_ref, o_ref, *,
                             true_b, tile_b, needs_mask):
    i = pl.program_id(0)

    # Synthetic DeeptypeModel.get_hidden_representations: dense + ReLU.
    # Operands arrive in their streamed dtype (f32 or bf16); MXU accumulates f32.
    reps = jnp.dot(x_ref[...], w_ref[...],
                   preferred_element_type=jnp.float32) + b_ref[...]
    reps = jnp.maximum(reps, 0.0)                               # f32 VPU

    # torch.norm(reps - centers, p=2, dim=1) -> per-row L2 distance (f32).
    diff = reps - c_ref[...].astype(jnp.float32)                # (tile_b, H)
    sq_sum = jnp.sum(diff * diff, axis=1, keepdims=True)        # (tile_b, 1)
    dists = jnp.sqrt(sq_sum)

    if needs_mask:
        # Tail tile is a partial boundary block (no wrapper-side pad): rows
        # past the true batch hold undefined VMEM data. jnp.where selects the
        # 0.0 branch regardless (NaN/Inf-safe), so they never bias the sum.
        row_ids = i * tile_b + lax.broadcasted_iota(jnp.int32, (tile_b, 1), 0)
        dists = jnp.where(row_ids < true_b, dists, 0.0)

    partial = jnp.sum(dists)                                    # this tile's sum
    # Lane-dense (1, 8, 128) block -> unmasked vst; wrapper reads [:, 0, 0].
    o_ref[...] = jnp.full(o_ref.shape, partial, dtype=jnp.float32)


def cluster_representation_loss(inputs, w, b, cluster_centers, *,
                                tile_b=512, matmul_dtype=jnp.float32):
    """inputs: (B, D_in); w: (D_in, H); b: (H,); cluster_centers: (B, H)."""
    B, D_in = inputs.shape
    H = w.shape[1]
    if cluster_centers.shape[0] != B:
        raise ValueError(
            f"Expected {B} cluster centers, but got {cluster_centers.shape[0]}.")

    op_bytes = jnp.dtype(matmul_dtype).itemsize
    # Cast the MXU operands in the wrapper so the DMA itself is narrower
    # (bf16 halves the dominant x / W HBM streams and their VMEM footprint).
    x = inputs.astype(matmul_dtype)
    w_op = w.astype(matmul_dtype)
    b32 = b.reshape(1, H).astype(jnp.float32)
    c = cluster_centers.astype(jnp.float32)   # centers stay f32: exact distance math

    # Per-generation VMEM budget (~48 MiB on v7x, ~96 MiB on v5e/v6e).
    try:
        vmem_cap = int(pltpu.get_tpu_info().vmem_capacity_bytes)
    except Exception:
        vmem_cap = 128 << 20
    vmem_budget = max(int(0.75 * vmem_cap), 8 << 20)

    def footprint(tb):
        x_tile = tb * D_in * op_bytes
        c_tile = tb * H * 4
        out_tile = 8 * 128 * 4
        resident = D_in * H * op_bytes + H * 4          # single-buffered W + bias
        interm = 3 * tb * H * 4                         # reps / diff / squares, f32
        return 2 * (x_tile + c_tile + out_tile) + resident + interm

    # Effective tile: big enough to amortize ~0.35 us/step, capped by the true
    # batch (keeps the small-B case a single exact block) and the VMEM budget.
    tb = max(8, min(_round_up(tile_b, 8), _round_up(B, 8)))
    while tb > 8 and footprint(tb) > vmem_budget:
        tb = max(8, _round_up(tb // 2, 8))

    num_tiles = int(pl.cdiv(B, tb))
    needs_mask = (num_tiles * tb != B)
    vmem_limit = int(min(max(footprint(tb) + (1 << 20), 4 << 20), vmem_budget))

    kernel = functools.partial(
        _cluster_rep_loss_kernel, true_b=B, tile_b=tb, needs_mask=needs_mask)

    cost = pl.CostEstimate(
        flops=2 * num_tiles * tb * D_in * H + 4 * num_tiles * tb * H,
        transcendentals=num_tiles * tb,                 # one sqrt per row
        bytes_accessed=(B * D_in * op_bytes            # x stream
                        + D_in * H * op_bytes + H * 4   # resident W + bias
                        + B * H * 4                     # centers stream
                        + num_tiles * 8 * 128 * 4),     # partials writeback
    )

    partials = pl.pallas_call(
        kernel,
        out_shape=jax.ShapeDtypeStruct((num_tiles, 8, 128), jnp.float32),
        grid_spec=pltpu.PrefetchScalarGridSpec(
            num_scalar_prefetch=0,
            grid=(num_tiles,),
            in_specs=[
                pl.BlockSpec((tb, D_in), lambda i: (i, 0)),          # x tile
                pl.BlockSpec((D_in, H), lambda i: (0, 0),
                             pipeline_mode=pl.Buffered(1)),          # W (resident, 1 buf)
                pl.BlockSpec((1, H), lambda i: (0, 0),
                             pipeline_mode=pl.Buffered(1)),          # bias (resident, 1 buf)
                pl.BlockSpec((tb, H), lambda i: (i, 0)),             # centers tile
            ],
            out_specs=pl.BlockSpec((1, 8, 128), lambda i: (i, 0, 0)),
        ),
        compiler_params=pltpu.CompilerParams(
            dimension_semantics=("parallel",),   # both v7x TCs split the batch grid
            vmem_limit_bytes=vmem_limit,
        ),
        cost_estimate=cost,
    )(x, w_op, b32, c)

    # Final mean: one tiny XLA reduce outside the kernel; divide by true B once.
    return jnp.sum(partials[:, 0, 0]) / B


def _reference_loss(inputs, w, b, cluster_centers):
    reps = jnp.maximum(inputs @ w + b, 0.0)
    return jnp.mean(jnp.sqrt(jnp.sum((reps - cluster_centers) ** 2, axis=1)))


if __name__ == "__main__":
    # Small deterministic problem: batch=8, input dim=32, hidden dim=128.
    B, D_IN, H = 8, 32, 128
    key = jax.random.PRNGKey(0)
    k_x, k_w, k_b, k_c = jax.random.split(key, 4)

    inputs = jax.random.normal(k_x, (B, D_IN), dtype=jnp.float32)
    # Deterministic synthetic "model" parameters (hidden layer weights).
    w = jax.random.normal(k_w, (D_IN, H), dtype=jnp.float32) * 0.1
    b = jax.random.normal(k_b, (H,), dtype=jnp.float32) * 0.01
    # One cluster center per batch element (already stacked: (B, H)).
    cluster_centers = jax.random.normal(k_c, (B, H), dtype=jnp.float32)

    ref = _reference_loss(inputs, w, b, cluster_centers)

    # f32 MXU path (exact vs reference; v5e-friendly).
    loss = cluster_representation_loss(inputs, w, b, cluster_centers)
    loss = jax.block_until_ready(loss)
    assert jnp.allclose(loss, ref, rtol=1e-5, atol=1e-5), (loss, ref)

    # bf16 MXU-operand path (v6e/v7x bandwidth option); f32 accumulation keeps
    # the distance math stable, but operands are bf16 so loosen the tolerance.
    loss_bf16 = cluster_representation_loss(
        inputs, w, b, cluster_centers, matmul_dtype=jnp.bfloat16)
    loss_bf16 = jax.block_until_ready(loss_bf16)
    assert jnp.allclose(loss_bf16, ref, rtol=2e-2, atol=2e-2), (loss_bf16, ref)

    # Ragged-batch path: no wrapper pad, partial boundary block + tail mask.
    B2 = 20
    k_x2, k_c2 = jax.random.split(jax.random.PRNGKey(1), 2)
    inputs2 = jax.random.normal(k_x2, (B2, D_IN), dtype=jnp.float32)
    centers2 = jax.random.normal(k_c2, (B2, H), dtype=jnp.float32)
    ref2 = _reference_loss(inputs2, w, b, centers2)
    loss2 = cluster_representation_loss(inputs2, w, b, centers2, tile_b=16)
    loss2 = jax.block_until_ready(loss2)
    assert jnp.allclose(loss2, ref2, rtol=1e-5, atol=1e-5), (loss2, ref2)

    print("KERNEL_OK")
</pallas_src>

<mosaic_0001>
module attributes {stable_mosaic.version = 11 : i64} {
  func.func @_cluster_rep_loss_kernel(%arg0: i32, %arg1: memref<8x32xf32, #tpu.memory_space<vmem>>, %arg2: memref<32x128xf32, #tpu.memory_space<vmem>>, %arg3: memref<1x128xf32, #tpu.memory_space<vmem>>, %arg4: memref<8x128xf32, #tpu.memory_space<vmem>>, %arg5: memref<1x8x128xf32, #tpu.memory_space<vmem>>) attributes {dimension_semantics = [#tpu.dimension_semantics<parallel>], iteration_bounds = array<i64: 1>, scalar_prefetch = 0 : i64, scratch_operands = 0 : i64, tpu.core_type = #tpu.core_type<tc>, window_params = [{transform_indices = @transform_0, window_bounds = array<i64: 8, 32>}, {pipeline_mode = #tpu.pipeline_mode<synchronous>, transform_indices = @transform_1, window_bounds = array<i64: 32, 128>}, {pipeline_mode = #tpu.pipeline_mode<synchronous>, transform_indices = @transform_2, window_bounds = array<i64: 1, 128>}, {transform_indices = @transform_3, window_bounds = array<i64: 8, 128>}, {transform_indices = @transform_4, window_bounds = array<i64: 1, 8, 128>}]} {
    %c0 = arith.constant 0 : index
    %c0_0 = arith.constant 0 : index
    %0 = vector.load %arg1[%c0, %c0_0] : memref<8x32xf32, #tpu.memory_space<vmem>>, vector<8x32xf32>
    %c0_1 = arith.constant 0 : index
    %c0_2 = arith.constant 0 : index
    %1 = vector.load %arg2[%c0_1, %c0_2] : memref<32x128xf32, #tpu.memory_space<vmem>>, vector<32x128xf32>
    %cst = arith.constant dense<0.000000e+00> : vector<8x128xf32>
    %2 = tpu.matmul %0, %1, %cst {dimension_numbers = #tpu.dot_dimension_numbers<[1], [0], [0], [1], [0, 0, 1, 1], [], []>} : vector<8x32xf32>, vector<32x128xf32>, vector<8x128xf32> -> vector<8x128xf32>
    %c0_3 = arith.constant 0 : index
    %c0_4 = arith.constant 0 : index
    %3 = vector.load %arg3[%c0_3, %c0_4] : memref<1x128xf32, #tpu.memory_space<vmem>>, vector<1x128xf32>
    %4 = vector.broadcast %3 : vector<1x128xf32> to vector<8x128xf32>
    %5 = arith.addf %2, %4 : vector<8x128xf32>
    %cst_5 = arith.constant 0.000000e+00 : f32
    %6 = vector.broadcast %cst_5 : f32 to vector<8x128xf32>
    %7 = arith.maximumf %5, %6 : vector<8x128xf32>
    %c0_6 = arith.constant 0 : index
    %c0_7 = arith.constant 0 : index
    %8 = vector.load %arg4[%c0_6, %c0_7] : memref<8x128xf32, #tpu.memory_space<vmem>>, vector<8x128xf32>
    %9 = arith.subf %7, %8 : vector<8x128xf32>
    %10 = arith.mulf %9, %9 : vector<8x128xf32>
    %cst_8 = arith.constant dense<0.000000e+00> : vector<8xf32>
    %11 = vector.multi_reduction <add>, %10, %cst_8 [1] : vector<8x128xf32> to vector<8xf32>
    %12 = vector.shape_cast %11 : vector<8xf32> to vector<8x1xf32>
    %13 = math.sqrt %12 : vector<8x1xf32>
    %14 = vector.shape_cast %13 : vector<8x1xf32> to vector<1x8x1xf32>
    %cst_9 = arith.constant dense<0.000000e+00> : vector<1xf32>
    %15 = vector.multi_reduction <add>, %14, %cst_9 [1, 2] : vector<1x8x1xf32> to vector<1xf32>
    %16 = vector.shape_cast %15 : vector<1xf32> to vector<1x1x1xf32>
    %17 = vector.extract %16[0, 0, 0] : f32 from vector<1x1x1xf32>
    %18 = vector.broadcast %17 : f32 to vector<1x8x128xf32>
    %c0_10 = arith.constant 0 : index
    %c0_11 = arith.constant 0 : index
    %c0_12 = arith.constant 0 : index
    %19 = vector.load %arg5[%c0_10, %c0_11, %c0_12] : memref<1x8x128xf32, #tpu.memory_space<vmem>>, vector<1x8x128xf32>
    tpu.vector_store %arg5[%c0_10, %c0_11, %c0_12], %18 {strides = array<i32>} : memref<1x8x128xf32, #tpu.memory_space<vmem>>, vector<1x8x128xf32>,
    return
  }
  func.func @transform_0(%arg0: i32) -> (i32, i32) {
    %c0_i32 = arith.constant 0 : i32
    %c0_i32_0 = arith.constant 0 : i32
    return %arg0, %c0_i32 : i32, i32
  }
  func.func @transform_1(%arg0: i32) -> (i32, i32) {
    %c0_i32 = arith.constant 0 : i32
    %c0_i32_0 = arith.constant 0 : i32
    %c0_i32_1 = arith.constant 0 : i32
    return %c0_i32, %c0_i32_0 : i32, i32
  }
  func.func @transform_2(%arg0: i32) -> (i32, i32) {
    %c0_i32 = arith.constant 0 : i32
    %c0_i32_0 = arith.constant 0 : i32
    %c0_i32_1 = arith.constant 0 : i32
    return %c0_i32, %c0_i32_0 : i32, i32
  }
  func.func @transform_3(%arg0: i32) -> (i32, i32) {
    %c0_i32 = arith.constant 0 : i32
    %c0_i32_0 = arith.constant 0 : i32
    return %arg0, %c0_i32 : i32, i32
  }
  func.func @transform_4(%arg0: i32) -> (i32, i32, i32) {
    %c0_i32 = arith.constant 0 : i32
    %c0_i32_0 = arith.constant 0 : i32
    %c0_i32_1 = arith.constant 0 : i32
    return %arg0, %c0_i32, %c0_i32_0 : i32, i32, i32
  }
}

</mosaic_0001>

<bundles_post_ra>
// kernel: tpu_custom_call.1
= control target key start
LH: loop header
LB: loop body
LE: loop exit
PB: predicated region body
PF: predicated region fallthrough
CT: control target
= control target key end

     0   :  { %9 = vsyncpa [#allocation3], 0  ;;  %s303_s0 = inlined_call_operand.hbm [shape: f32[8,32], index: 0, kind: input, shape index: {}]   ;;  %s304_s1 = inlined_call_operand.hbm [shape: f32[32,128], index: 1, kind: input, shape index: {}]   ;;  %s305_s2 = inlined_call_operand.vmem [shape: f32[1,128], index: 2, kind: input, shape index: {}]   ;;  %s306_s3 = inlined_call_operand.hbm [shape: f32[8,128], index: 3, kind: input, shape index: {}]   ;;  %s307_s4 = inlined_call_operand.hbm [shape: f32[1,8,128], index: 4, kind: output, shape index: {}]  }
   0x1   :  { %10 = vsyncpa [#allocation6], 0  ;;  %s27_s17 = sshll.u32 %s304_s1, 4  ;;  %s28_s17 = int_to_ptr.hbm [resolvable:$true] %s27_s17 }
   0x2   :  { %11 = vsyncpa [#allocation4], 0  ;;  %s257_s18 = smov [#allocation5]   ;;  %s17_s22 = sshll.u32 %s303_s0, 4  ;;  %s18_s22 = int_to_ptr.hbm [resolvable:$true] %s17_s22 }
   0x3   :  { %s29_s19 = sshll.u32 %s257_s18, 4  ;;  %s258_s23 = smov 128   ;;  %s30_s19 = int_to_ptr.vmem [resolvable:$true] %s29_s19 }
   0x4   :  { %s259_s24 = smov 8   ;;  %s260_s25 = smov [#allocation2]  }
   0x5   :  { %35 = dma.hbm_to_vmem [thread:$0]  %s28_s17, 512, %s30_s19, [#allocation6], %s258_s23, %s258_s23, %s259_s24  }
   0x6   :  { %s19_s26 = sshll.u32 %s260_s25, 4  ;;  %s43_s29 = sshll.u32 %s306_s3, 4  ;;  %s20_s26 = int_to_ptr.vmem [resolvable:$true] %s19_s26  ;;  %s44_s29 = int_to_ptr.hbm [resolvable:$true] %s43_s29 }
   0x7   :  { %22 = dma.hbm_to_vmem [thread:$0]  %s18_s22, 128, %s20_s26, [#allocation3]  }
   0x8   :  { %s261_s1 = smov [#allocation7]  }
   0x9   :  { %s45_s30 = sshll.u32 %s261_s1, 4  ;;  %s46_s30 = int_to_ptr.vmem [resolvable:$true] %s45_s30 }
   0xa   :  { %48 = dma.hbm_to_vmem [thread:$0]  %s44_s29, 128, %s46_s30, [#allocation6]  }
   0xb   :  { %251 = dma.done.wait [#allocation3], 128  }
   0xc   :  { %252 = vsyncadd [#allocation3], 4294967168 }
   0xd   :  { %253 = dma.done.wait [#allocation6], 640  }
   0xe   :  { %254 = vsyncadd [#allocation6], 4294966656  ;;  %v65_v0 = vld [vmem:[#allocation5 + $0x18] sm:$0xff]  ;;  %v64_v1 = vld [vmem:[#allocation5 + $0x10] sm:$0xff]  ;;  %vm70_vm0 = vcmask 261120   ;;  %vm112_vm2 = vcmask 7168  }
   0xf   :  { %86 = vmatpush.msra.mxu0 %v65_v0  ;;  %v63_v2 = vld [vmem:[#allocation5 + $0x8] sm:$0xff]  ;;  %v62_v3 = vld [vmem:[#allocation5] sm:$0xff]  ;;  %v61_v4 = vld [vmem:[#allocation2] sm:$0xff]  ;;  %s132_s8 = sshll.u32 %s307_s4, 4  ;;  %s133_s8 = int_to_ptr.hbm [resolvable:$true] %s132_s8 }
  0x10   :  { %v152_v5 = vld [vmem:[%s305_s2] ss:$0 sm:$0xff]  ;;  %v95_v8 = vld [vmem:[#allocation7] sm:$0xff]  ;;  %s262_s2 = smov [#allocation8]  }
  0x11   :  { %87 = vmatpush.msra.mxu0 %v64_v1  ;;  %s130_s5 = sshll.u32 %s262_s2, 4  ;;  %s131_s5 = int_to_ptr.vmem [resolvable:$true] %s130_s5 }
  0x13   :  { %88 = vmatpush.msra.mxu0 %v63_v2 }
  0x15   :  { %89 = vmatpush.msra.mxu0 %v62_v3 }
  0x16   :  { %143 = vmatmul.msk.f32.vlgmr.msra.gmra.mxu0 %vm70_vm0, %v61_v4 }
  0x93   :  { %v91_v6 = vpop.f32.mrf.mxu0 }
  0x94   :  { %v92_v7 = vadd.f32 %v152_v5, %v91_v6 }
  0x96   :  { %v94_v9 = vmax.f32 %v92_v7, 0.0 }
  0x98   :  { %v96_v10 = vsub.f32 %v94_v9, %v95_v8 }
  0x9a   :  { %v97_v11 = vmul.f32 %v96_v10, %v96_v10 }
  0x9c   :  { %98 = vadd.xlane.f32.xlu0 %v97_v11 }
 0x10f   :  { %v99_v12 = vpop.xlane.xlu0 %98 }
 0x110   :  { %153 = vrsqrt.f32 %v99_v12  ;;  %vm107_vm1 = vcmp.eq.f32.partialorder %v99_v12, inf  ;;  %v110_v20 = vand.u32 2147483648, %v99_v12  ;;  %vm109_vm3 = vcmp.eq.f32.partialorder %v99_v12, 0.0 }
 0x116   :  { %v154_v13 = vpop.eup %153 }
 0x117   :  { %v101_v14 = vmul.f32 %v154_v13, %v99_v12 }
 0x119   :  { %v102_v15 = vmul.f32 %v154_v13, %v101_v14 }
 0x11b   :  { %v103_v16 = vmul.f32 0.5, %v102_v15 }
 0x11d   :  { %v104_v17 = vsub.f32 1.5, %v103_v16 }
 0x11f   :  { %v105_v18 = vmul.f32 %v154_v13, %v104_v17 }
 0x121   :  { %v106_v19 = vmul.f32 %v105_v18, %v99_v12 }
 0x123   :  { %v108_v21 = vsel %vm107_vm1, %v99_v12, %v106_v19 }
 0x124   :  { %v111_v22 = vsel %vm109_vm3, %v110_v20, %v108_v21 }
 0x125   :  { %v113_v23 = vsel %vm112_vm2, %v111_v22, 0.0 }
 0x126   :  { %114 = vadd.xlane.f32.xlu0 %v113_v23 }
 0x199   :  { %v115_v24 = vpop.xlane.xlu0 %114 }
 0x19a   :  { %v116_v25 = vrot.slane %v115_v24, 4 }
 0x19c   :  { %v117_v26 = vadd.f32 %v116_v25, %v115_v24 }
 0x19e   :  { %v118_v27 = vrot.slane %v117_v26, 2 }
 0x1a0   :  { %v119_v28 = vadd.f32 %v118_v27, %v117_v26 }
 0x1a2   :  { %v120_v29 = vrot.slane %v119_v28, 1 }
 0x1a4   :  { %v121_v30 = vadd.f32 %v120_v29, %v119_v28 }
 0x1a6   :  { %144 = vpush %v121_v30 }
 0x1d7   :  { %s145_s9 = spop %144 }
 0x1d8   :  { %v123_v31 = vstv %s145_s9 }
 0x1d9   :  { %124 = vst [vmem:[#allocation8] sm:$0xff] %v123_v31 }
 0x1da   :  { %135 = dma.vmem_to_hbm [thread:$0]  %s131_s5, 128, %s133_s8, [#allocation4]  }
 0x1db   :  { %255 = dma.done.wait [#allocation4], 128  }
 0x1dc   :  { %256 = vsyncadd [#allocation4], 4294967168 }
 0x1dd   :  { %140 = vsyncpa [#allocation3], 1 }
 0x1de   :  { %141 = vsyncpa [#allocation6], 1 }
 0x1df   :  { %142 = vsyncpa [#allocation4], 1 }

</bundles_post_ra>
